<compile_context>
chip_gen: v6e
topology: v6e:2x2x1
jax: 0.10.0
libtpu: 0.0.40
codegen_flags: <defaults>
</compile_context>

<pallas_src>
import jax
import jax.numpy as jnp
from jax.experimental import pallas as pl
from jax.experimental.pallas import tpu as pltpu

NUM_HEADS = 4


def _round_up(x, m):
    return ((x + m - 1) // m) * m


def _multihead_linear_kernel(x_ref, w_ref, o_ref):
    # x_ref : (tm, H)   activation tile (resident across head / V-tile steps)
    # w_ref : (H, tn)   weight tile of the current head (leading head dim squeezed)
    # o_ref : (tm, tn)  logits tile of the current head
    o_ref[...] = jnp.dot(
        x_ref[...], w_ref[...], preferred_element_type=jnp.float32
    ).astype(o_ref.dtype)


def multihead_forward(hidden_states, weights_stacked, *, compute_dtype=None,
                      tm_max=256, tn_max=1024):
    """hidden_states: (B, S, H); weights_stacked: (4, H, V).

    Returns a tuple of four (B, S, V) logits, matching the PyTorch module.
    compute_dtype=jnp.bfloat16 streams x/W as bf16 (f32 accumulation kept).
    """
    B, S, H = hidden_states.shape
    n_heads, H_w, V = weights_stacked.shape
    assert n_heads == NUM_HEADS and H_w == H

    out_dtype = hidden_states.dtype
    M = B * S
    x = hidden_states.reshape(M, H)
    w = weights_stacked
    if compute_dtype is not None:
        x = x.astype(compute_dtype)
        w = w.astype(compute_dtype)

    # MXU / lane-aligned tiles, capped so double-buffered tiles fit scoped
    # VMEM on all generations (v7x has only 64 MiB physical VMEM per TC).
    tm = min(tm_max, _round_up(M, 8))
    tn = min(tn_max, _round_up(V, 128))
    M_pad = _round_up(M, tm)
    V_pad = _round_up(V, tn)
    if M_pad != M:
        x = jnp.pad(x, ((0, M_pad - M), (0, 0)))
    if V_pad != V:
        w = jnp.pad(w, ((0, 0), (0, 0), (0, V_pad - V)))

    grid = (M_pad // tm, NUM_HEADS, V_pad // tn)

    in_bytes = jnp.dtype(x.dtype).itemsize
    out_bytes = jnp.dtype(out_dtype).itemsize
    cost = pl.CostEstimate(
        flops=2 * NUM_HEADS * M_pad * H * V_pad,
        bytes_accessed=(M_pad * H * in_bytes
                        + NUM_HEADS * H * V_pad * in_bytes
                        + NUM_HEADS * M_pad * V_pad * out_bytes),
        transcendentals=0,
    )
    # x, W, out tiles double-buffered; leave headroom, cap for v7x's 64 MiB.
    vmem_needed = 2 * (tm * H * in_bytes + H * tn * in_bytes + tm * tn * out_bytes)
    vmem_limit = int(min(max(2 * vmem_needed, 32 * 1024 * 1024), 48 * 1024 * 1024))

    # NOTE: for very small M (decode regime) the weight stream dominates; a
    # deeper pipeline (pipeline_mode=pl.Buffered(3) on the weight spec) can be
    # enabled there if VMEM budget allows — left at the default depth here.
    out = pl.pallas_call(
        _multihead_linear_kernel,
        out_shape=jax.ShapeDtypeStruct((NUM_HEADS, M_pad, V_pad), out_dtype),
        grid_spec=pltpu.PrefetchScalarGridSpec(
            num_scalar_prefetch=0,
            grid=grid,
            in_specs=[
                # Activation tile: depends only on the M index → fetched once
                # per M-tile (M axis is outermost), reused across heads/V-tiles.
                pl.BlockSpec((tm, H), lambda i, h, n: (i, 0)),
                # Per-head weight tile; leading head dim squeezed away.
                pl.BlockSpec((None, H, tn), lambda i, h, n: (h, 0, n)),
            ],
            out_specs=pl.BlockSpec((None, tm, tn), lambda i, h, n: (h, i, n)),
        ),
        compiler_params=pltpu.CompilerParams(
            dimension_semantics=("parallel", "parallel", "arbitrary"),
            vmem_limit_bytes=vmem_limit,
        ),
        cost_estimate=cost,
    )(x, w)

    out = out[:, :M, :V].reshape(NUM_HEADS, B, S, V)
    return tuple(out[i] for i in range(NUM_HEADS))


def init_params(key, hidden_size, vocab_size, dtype=jnp.float32):
    """Deterministic synthetic weights.

    PyTorch nn.Linear stores weight as (vocab_size, hidden_size); we keep the
    stacked, transposed form (4, hidden_size, vocab_size) for the kernel.
    Initialization mimics nn.Linear's kaiming-uniform bound 1/sqrt(hidden).
    """
    bound = 1.0 / (hidden_size ** 0.5)
    keys = jax.random.split(key, NUM_HEADS)
    ws = [
        jax.random.uniform(k, (hidden_size, vocab_size), dtype=dtype,
                           minval=-bound, maxval=bound)
        for k in keys
    ]
    return jnp.stack(ws, axis=0)  # (4, H, V)


if __name__ == "__main__":
    # Small shapes consistent with the module's forward:
    #   hidden_states: (batch=2, seq=8, hidden=32), vocab=128
    B, S, H, V = 2, 8, 32, 128
    key = jax.random.PRNGKey(0)
    k_x, k_w = jax.random.split(key)

    hidden_states = jax.random.normal(k_x, (B, S, H), dtype=jnp.float32)
    weights = init_params(k_w, H, V, dtype=jnp.float32)

    # Exact-dtype path (matches PyTorch f32 numerics).
    fwd = jax.jit(multihead_forward)
    logits = jax.block_until_ready(fwd(hidden_states, weights))

    refs = tuple(hidden_states @ weights[i] for i in range(NUM_HEADS))
    for got, ref in zip(logits, refs):
        assert got.shape == (B, S, V)
        assert jnp.allclose(got, ref, atol=1e-5, rtol=1e-5)

    # bf16-stream path (perf recommendation): f32 accumulation, looser tol.
    fwd_bf16 = jax.jit(
        lambda h, w: multihead_forward(h, w, compute_dtype=jnp.bfloat16))
    logits_bf16 = jax.block_until_ready(fwd_bf16(hidden_states, weights))
    for got, ref in zip(logits_bf16, refs):
        assert got.shape == (B, S, V)
        assert jnp.allclose(got, ref, atol=5e-2, rtol=5e-2)

    print("KERNEL_OK")
</pallas_src>

<mosaic_0001>
module attributes {stable_mosaic.version = 11 : i64} {
  func.func @_multihead_linear_kernel(%arg0: i32, %arg1: i32, %arg2: i32, %arg3: memref<16x32xf32, #tpu.memory_space<vmem>>, %arg4: memref<1x32x128xf32, #tpu.memory_space<vmem>>, %arg5: memref<1x16x128xf32, #tpu.memory_space<vmem>>) attributes {dimension_semantics = [#tpu.dimension_semantics<parallel>, #tpu.dimension_semantics<parallel>, #tpu.dimension_semantics<arbitrary>], iteration_bounds = array<i64: 1, 4, 1>, scalar_prefetch = 0 : i64, scratch_operands = 0 : i64, tpu.core_type = #tpu.core_type<tc>, window_params = [{transform_indices = @transform_0, window_bounds = array<i64: 16, 32>}, {transform_indices = @transform_1, window_bounds = array<i64: 1, 32, 128>}, {transform_indices = @transform_2, window_bounds = array<i64: 1, 16, 128>}]} {
    %c0 = arith.constant 0 : index
    %c0_0 = arith.constant 0 : index
    %0 = vector.load %arg3[%c0, %c0_0] : memref<16x32xf32, #tpu.memory_space<vmem>>, vector<16x32xf32>
    %c0_1 = arith.constant 0 : index
    %c0_2 = arith.constant 0 : index
    %c0_3 = arith.constant 0 : index
    %1 = vector.load %arg4[%c0_1, %c0_2, %c0_3] : memref<1x32x128xf32, #tpu.memory_space<vmem>>, vector<1x32x128xf32>
    %2 = vector.shape_cast %1 : vector<1x32x128xf32> to vector<32x128xf32>
    %cst = arith.constant dense<0.000000e+00> : vector<16x128xf32>
    %3 = tpu.matmul %0, %2, %cst {dimension_numbers = #tpu.dot_dimension_numbers<[1], [0], [0], [1], [0, 0, 1, 1], [], []>} : vector<16x32xf32>, vector<32x128xf32>, vector<16x128xf32> -> vector<16x128xf32>
    %c0_4 = arith.constant 0 : index
    %c0_5 = arith.constant 0 : index
    %c0_6 = arith.constant 0 : index
    %4 = vector.load %arg5[%c0_4, %c0_5, %c0_6] : memref<1x16x128xf32, #tpu.memory_space<vmem>>, vector<1x16x128xf32>
    %5 = vector.shape_cast %4 : vector<1x16x128xf32> to vector<16x128xf32>
    %6 = vector.shape_cast %3 : vector<16x128xf32> to vector<1x16x128xf32>
    tpu.vector_store %arg5[%c0_4, %c0_5, %c0_6], %6 {strides = array<i32>} : memref<1x16x128xf32, #tpu.memory_space<vmem>>, vector<1x16x128xf32>,
    return
  }
  func.func @transform_0(%arg0: i32, %arg1: i32, %arg2: i32) -> (i32, i32) {
    %c0_i32 = arith.constant 0 : i32
    %c0_i32_0 = arith.constant 0 : i32
    return %arg0, %c0_i32 : i32, i32
  }
  func.func @transform_1(%arg0: i32, %arg1: i32, %arg2: i32) -> (i32, i32, i32) {
    %c0_i32 = arith.constant 0 : i32
    %c0_i32_0 = arith.constant 0 : i32
    return %arg1, %c0_i32, %arg2 : i32, i32, i32
  }
  func.func @transform_2(%arg0: i32, %arg1: i32, %arg2: i32) -> (i32, i32, i32) {
    %c0_i32 = arith.constant 0 : i32
    return %arg1, %arg0, %arg2 : i32, i32, i32
  }
}

</mosaic_0001>

<bundles_post_ra>
// kernel: multihead_forward.1
= control target key start
LH: loop header
LB: loop body
LE: loop exit
PB: predicated region body
PF: predicated region fallthrough
CT: control target
= control target key end

     0   :  { %7 = vsyncpa [#allocation3], 0  ;;  %s802_s0 = inlined_call_operand.hbm [shape: f32[16,32], index: 0, kind: input, shape index: {}]   ;;  %s803_s1 = inlined_call_operand.hbm [shape: f32[4,32,128], index: 1, kind: input, shape index: {}]   ;;  %s804_s2 = inlined_call_operand.vmem [shape: f32[4,16,128], index: 2, kind: output, shape index: {}]  }
   0x1   :  { %8 = vsyncpa [#allocation5], 0 }
   0x2   :  { %10 = vsyncpa [#allocation5 + $0x1], 0  ;;  %s673_s9 = smov 0   ;;  %s675_s10 = smov 0  }
   0x3   :  { %s677_s11 = smov 0   ;;  %s679_s12 = smov 0  }
   0x4   :  { %s681_s13 = smov 0   ;;  %s683_s14 = smov 0  }
   0x5 LB: > { %s440_s15 = sadd.s32 4294967295, %s652_s14   ;;  %p83_p0 = scmp.ne.s32.totalorder %s636_s10, %s632_s9  ;;  %s652_s14 = sphi %s683_s14, %s16_s14   ;;  %s648_s13 = sphi %s681_s13, %s814_s13   ;;  %s644_s12 = sphi %s679_s12, %s813_s12   ;;  %s640_s11 = sphi %s677_s11, %s812_s11   ;;  %s636_s10 = sphi %s675_s10, %s811_s10   ;;  %s632_s9 = sphi %s673_s9, %s810_s9  }
   0x6   : > { %p703_p1 = scmp.eq.s32.totalorder %s440_s15, 0  ;;  %p442_p2 = scmp.ge.s32.totalorder %s652_s14, 1 }
   0x7   : > { %p124_p3 = scmp.lt.s32.totalorder %s652_s14, 5  ;;  %s654_s19 = smov [#allocation2]  }
   0x8   : > { %p711_p4 = por %p703_p1, %p83_p0  ;;  %s139_s20 = sshll.u32 %s654_s19, 4  ;;  %s140_s20 = int_to_ptr.vmem [resolvable:$true] %s139_s20 }
   0x9   : > { %p715_p5 = pnand %p442_p2, %p124_p3  ;;  %s31_s22 = sadd.s32 1, %s648_s13 }
   0xa   : > { %s555_s23 = scalar_lea.vmem %s140_s20, 256  ;;  %p563_p12 = scmp.lt.s32.totalorder %s140_s20, %s140_s20 }
   0xb   : > { %p482_p6 = pneg %p715_p5  ;;  %p556_p9 = scmp.ne.s32.totalorder %s140_s20, %s555_s23 }
   0xc   : > { %p564_p13 = scmp.lt.s32.totalorder %s555_s23, %s555_s23 }
   0xd   : > { %p723_p7 = pnand %p482_p6, %p703_p1 }
   0xe   : > { %p565_p0 = por %p564_p13, %p563_p12 }
   0xf   : > { %p546_p8 = pneg %p723_p7 }
  0x11   : > { %p558_p10 = pnand %p556_p9, %p546_p8 }
  0x13   : > { %p559_p11 = pneg %p558_p10 }
  0x15   : > { %p566_p2 = pnand %p565_p0, %p559_p11 }
  0x17   : > { %569 = shalt.err (!%p566_p2)
}
  0x18   : > { %s655_s24 = smov 128   ;;  %s656_s25 = smov 8  }
  0x19   : > { %485 = dma.hbm_to_vmem [thread:$0]  (!%p723_p7), %s802_s0, 256, %s140_s20, [#allocation3], %s655_s24, %s655_s24, %s656_s25  }
  0x1a   : > { %p33_p3 = scmp.ge.s32.totalorder %s31_s22, 4  ;;  %s70_s28 = sadd.s32 1, %s640_s11 }
  0x1b   : > { %p77_p6 = scmp.ne.s32.totalorder %s640_s11, %s636_s10  ;;  %p78_p8 = scmp.eq.s32.totalorder %s652_s14, 0 }
  0x1c   : > { %s816_s22 = smov (%p33_p3, %s31_s22), 0  ;;  %p491_p10 = scmp.lt.s32.totalorder %s652_s14, 4 }
  0x1d   : > { %p79_p9 = por %p78_p8, %p77_p6  ;;  %s65_s29 = ssub.s32 %s648_s13, %s816_s22 }
  0x1e   : > { %s153_s30 = sand.u32 1, %s640_s11   ;;  %p68_p11 = scmp.eq.s32.totalorder %s65_s29, 0 }
  0x1f   : > { %s445_s3 = sshll.u32 %s153_s30, 5  ;;  %s457_s4 = sshll.u32 %s648_s13, 9 }
  0x20   : > { %s750_s5 = scalar_select %p68_p11, %s640_s11, %s70_s28  }
  0x21   : > { %s164_s8 = scalar_lea.hbm %s803_s1, %s457_s4  ;;  %s157_s9 = scalar_lea.vmem [#allocation4], %s445_s3 }
  0x22   : > { %s165_s15 = sshll.u32 %s157_s9, 4  ;;  %p755_p7 = pnand %p491_p10, %p79_p9  ;;  %s166_s15 = int_to_ptr.vmem [resolvable:$true] %s165_s15 }
  0x23   : > { %s154_s20 = scalar_lea.sflag [#allocation5], %s153_s30  ;;  %s583_s21 = scalar_lea.vmem %s166_s15, 512 }
  0x24   : > { %p572_p12 = pneg %p755_p7  ;;  %p584_p13 = scmp.ne.s32.totalorder %s166_s15, %s583_s21 }
  0x25   : > { %s657_s23 = smov [#allocation4]  }
  0x26   : > { %p586_p0 = pnand %p584_p13, %p572_p12  ;;  %s588_s26 = sshll.u32 %s657_s23, 4  ;;  %s589_s26 = int_to_ptr.vmem [resolvable:$false] %s588_s26 }
  0x27   : > { %s590_s27 = scalar_lea.vmem %s589_s26, 1024  ;;  %p591_p3 = scmp.lt.s32.totalorder %s166_s15, %s589_s26 }
  0x28   : > { %p587_p2 = pneg %p586_p0  ;;  %p592_p6 = scmp.lt.s32.totalorder %s590_s27, %s583_s21 }
  0x2a   : > { %p593_p8 = por %p592_p6, %p591_p3 }
  0x2c   : > { %p594_p9 = pnand %p593_p8, %p587_p2 }
  0x2e   : > { %597 = shalt.err (!%p594_p9)
}
  0x2f   : > { %489 = dma.hbm_to_vmem [thread:$0]  (!%p755_p7), %s164_s8, 512, %s166_s15, %s154_s20, %s655_s24, %s655_s24, %s656_s25  }
  0x30   : > { %177 = sbr.rel (%p715_p5) target bundleno = 263 (0x107), region = 28 }
  0x35   : > { %623 = dma.done.wait (%p703_p1), [#allocation3], 256  }
  0x36   : > { %625 = vsyncadd (%p703_p1), [#allocation3], 4294967040  ;;  %s183_s28 = sand.u32 1, %s636_s10  }
  0x37   : > { %s450_s29 = sshll.u32 %s183_s28, 5  ;;  %s184_s30 = scalar_lea.sflag [#allocation5], %s183_s28 }
  0x38   : > { %s187_s3 = scalar_lea.vmem [#allocation4], %s450_s29 }
  0x39   : > { %627 = dma.done.wait (%p711_p4), %s184_s30, 512  }
  0x3a   : > { %629 = vsyncadd (%p711_p4), %s184_s30, 4294966784  ;;  %vm235_vm0 = vcmask 261120   ;;  %v234_v0 = vld [vmem:[%s187_s3 + $0x18] sm:$0xff]  ;;  %v233_v1 = vld [vmem:[%s187_s3 + $0x10] sm:$0xff]  ;;  %p217_p1 = scmp.lt.s32.totalorder %s644_s12, 3 }
  0x3b   : > { %465 = vmatprep.subr.mxu0 %v234_v0  ;;  %v229_v2 = vld [vmem:[#allocation2] sm:$0xff]  ;;  %v232_v3 = vld [vmem:[%s187_s3 + $0x8] sm:$0xff]  ;;  %v231_v4 = vld [vmem:[%s187_s3] sm:$0xff] }
  0x3c   : > { %466 = vmatpush3.msra.mxu0 %v234_v0  ;;  %473 = vmatprep.mubr.msk.f32.mxu0 %vm235_vm0, %v229_v2  ;;  %v230_v5 = vld [vmem:[#allocation2 + $0x8] sm:$0xff]  ;;  %s818_s12 = smov (!%p217_p1, %s644_s12), 3 }
  0x3d   : > { %467 = vmatprep.subr.mxu0 %v233_v1  ;;  %s458_s16 = sshll.u32 %s818_s12, 4 }
  0x3e   : > { %468 = vmatpush3.msra.mxu0 %v233_v1  ;;  %s227_s24 = scalar_lea.vmem %s804_s2, %s458_s16 }
  0x3f   : > { %469 = vmatprep.subr.mxu0 %v232_v3 }
  0x40   : > { %470 = vmatpush3.msra.mxu0 %v232_v3 }
  0x41   : > { %471 = vmatprep.subr.mxu0 %v231_v4 }
  0x42   : > { %472 = vmatpush3.msra.mxu0 %v231_v4 }
  0x43   : > { %474 = vmatmul.mubr.msk.f32.vlgmr.msra.gmra.mxu0 %vm235_vm0, %v230_v5 }
 0x103   : > { %v475_v6 = vpop.f32.mrf.mxu0 }
 0x104   : > { %318 = vst [vmem:[%s227_s24 + $0x8] sm:$0xff] %v475_v6 }
 0x105   : > { %v308_v7 = vpop.f32.mrf.mxu0 }
 0x106   : > { %317 = vst [vmem:[%s227_s24] sm:$0xff] %v308_v7 }
 0x107 PF: > { %s16_s14 = sadd.s32 1, %s652_s14   ;;  %s810_s9 = smov %s636_s10 }
 0x108   : > { %p13_p4 = scmp.ge.s32.totalorder %s16_s14, 6   ;;  %s811_s10 = smov %s640_s11 }
 0x109   : > { %s812_s11 = smov %s750_s5  ;;  %s813_s12 = smov %s648_s13 }
 0x10a   : > { %s814_s13 = smov %s816_s22  ;;  %15 = sbr.rel (!%p13_p4) target bundleno = 5 (0x5), region = 74 }
 0x10f   :  { %355 = vsyncpa [#allocation3], 1 }
 0x110   :  { %357 = vsyncpa [#allocation3 + $0x1], 1 }
 0x111   :  { %358 = vsyncpa [#allocation5], 1 }
 0x112   :  { %360 = vsyncpa [#allocation5 + $0x1], 1 }

</bundles_post_ra>
